<compile_context>
chip_gen: v7x
topology: tpu7x:2x2x1
jax: 0.10.0
libtpu: 0.0.40
codegen_flags: <defaults>
</compile_context>

<pallas_src>
import functools

import jax
import jax.numpy as jnp
from jax import lax
from jax.experimental import pallas as pl
from jax.experimental.pallas import tpu as pltpu


def _fused_conv_bn_relu_kernel(xc_ref, w_ref, g_ref, b_ref, o_ref, *, eps):
    # xc_ref: (K_pad, N*HW)  bf16  im2col'd input (K rows ordered (kh, kw, c_in))
    # w_ref : (C_out, K_pad) bf16  reshaped conv weight
    # g_ref : (C_out, 1)     f32   BN gamma
    # b_ref : (C_out, 1)     f32   BN beta
    # o_ref : (C_out, N*HW)  f32
    # One lane-dense MXU matmul for the whole batch; f32 accumulation.
    y = jnp.dot(w_ref[...], xc_ref[...], preferred_element_type=jnp.float32)  # (C_out, NHW)

    # Train-mode BatchNorm, single pass over y for the statistics.
    mean = jnp.mean(y, axis=1, keepdims=True)                 # (C_out, 1)
    meansq = jnp.mean(y * y, axis=1, keepdims=True)           # (C_out, 1)
    var = meansq - mean * mean                                # biased variance
    inv = lax.rsqrt(var + eps)

    # Fold BN into a per-channel affine, then a 2-op/element epilogue + ReLU.
    scale = g_ref[...] * inv                                  # (C_out, 1)
    shift = b_ref[...] - mean * scale                         # (C_out, 1)
    o_ref[...] = jnp.maximum(y * scale + shift, 0.0)


def conv_bn_relu(x_nchw, w_oihw, conv_bias, gamma, beta, *, padding, dilation, eps=1e-5):
    """Forward pass of ConvBn2d_D (stride=1, train-mode BN batch stats + ReLU).

    `conv_bias` is accepted for API parity but is mathematically cancelled by the
    train-mode BatchNorm mean subtraction, so it is not fed to the kernel.
    (If eval-mode / running-stats BN were added, the bias would have to be restored.)
    """
    del conv_bias  # cancels exactly in (y - mean); dead compute + dead DMA otherwise.

    N, C_in, H, W = x_nchw.shape
    C_out, _, KH, KW = w_oihw.shape
    d = dilation
    H_out = H + 2 * padding - d * (KH - 1)
    W_out = W + 2 * padding - d * (KW - 1)
    HW = H_out * W_out
    NHW = N * HW
    K = KH * KW * C_in
    K_pad = ((K + 7) // 8) * 8                                # sublane granule

    # --- wrapper-side glue (tiny, fused by XLA): pad + im2col + weight reshape ---
    # TODO: for real shapes move this im2col inside the kernel (see header note).
    x = x_nchw.astype(jnp.float32)
    x_pad = jnp.pad(x, ((0, 0), (0, 0), (padding, padding), (padding, padding)))
    patches = [
        x_pad[:, :, kh * d:kh * d + H_out, kw * d:kw * d + W_out]   # (N, C_in, Ho, Wo)
        for kh in range(KH) for kw in range(KW)
    ]
    cols = jnp.stack(patches, axis=0)                         # (KH*KW, N, C_in, Ho, Wo)
    cols = jnp.transpose(cols, (0, 2, 1, 3, 4))               # (KH*KW, C_in, N, Ho, Wo)
    x_cols = cols.reshape(K, NHW)                             # rows (kh,kw,ci), cols (n,hw)
    x_cols = jnp.pad(x_cols, ((0, K_pad - K), (0, 0))).astype(jnp.bfloat16)

    w_mat = jnp.transpose(w_oihw, (0, 2, 3, 1)).reshape(C_out, K)
    w_mat = jnp.pad(w_mat, ((0, 0), (0, K_pad - K))).astype(jnp.bfloat16)

    g = gamma.reshape(C_out, 1).astype(jnp.float32)
    b = beta.reshape(C_out, 1).astype(jnp.float32)

    fused = pl.pallas_call(
        functools.partial(_fused_conv_bn_relu_kernel, eps=eps),
        out_shape=jax.ShapeDtypeStruct((C_out, NHW), jnp.float32),
        grid_spec=pltpu.PrefetchScalarGridSpec(
            num_scalar_prefetch=0,
            grid=(1,),
            in_specs=[
                pl.BlockSpec((K_pad, NHW), lambda i: (0, 0)),
                pl.BlockSpec((C_out, K_pad), lambda i: (0, 0)),
                pl.BlockSpec((C_out, 1), lambda i: (0, 0)),
                pl.BlockSpec((C_out, 1), lambda i: (0, 0)),
            ],
            out_specs=pl.BlockSpec((C_out, NHW), lambda i: (0, 0)),
        ),
        compiler_params=pltpu.CompilerParams(dimension_semantics=("arbitrary",)),
        cost_estimate=pl.CostEstimate(
            flops=2 * C_out * K_pad * NHW + 6 * C_out * NHW,
            transcendentals=C_out,
            bytes_accessed=2 * (K_pad * NHW + C_out * K_pad)
            + 4 * (2 * C_out + C_out * NHW),
        ),
    )
    out = fused(x_cols, w_mat, g, b)                          # (C_out, N*HW), n-major lanes
    # Wrapper-side relayout to NCHW (tiny at these sizes).
    return jnp.transpose(out.reshape(C_out, N, H_out, W_out), (1, 0, 2, 3))


def reference(x, w, b, gamma, beta, *, padding, dilation, eps=1e-5):
    y = lax.conv_general_dilated(
        x, w, window_strides=(1, 1),
        padding=[(padding, padding), (padding, padding)],
        rhs_dilation=(dilation, dilation),
        dimension_numbers=("NCHW", "OIHW", "NCHW"))
    y = y + b.reshape(1, -1, 1, 1)                            # bias kept here on purpose
    mean = y.mean(axis=(0, 2, 3), keepdims=True)
    var = jnp.square(y - mean).mean(axis=(0, 2, 3), keepdims=True)
    out = (y - mean) * lax.rsqrt(var + eps) * gamma.reshape(1, -1, 1, 1) + beta.reshape(1, -1, 1, 1)
    return jnp.maximum(out, 0.0)


if __name__ == "__main__":
    # Small shapes consistent with the module: Conv2d(4, 8, k=3, padding=2, dilation=2)
    N, C_in, C_out, H, W = 2, 4, 8, 16, 16
    K, PAD, DIL = 3, 2, 2

    key = jax.random.PRNGKey(0)
    k1, k2, k3, k4, k5 = jax.random.split(key, 5)
    x = jax.random.normal(k1, (N, C_in, H, W), jnp.float32)
    w = jax.random.normal(k2, (C_out, C_in, K, K), jnp.float32) * 0.1
    b = jax.random.normal(k3, (C_out,), jnp.float32) * 0.1
    gamma = 1.0 + 0.1 * jax.random.normal(k4, (C_out,), jnp.float32)
    beta = 0.1 * jax.random.normal(k5, (C_out,), jnp.float32)

    out = conv_bn_relu(x, w, b, gamma, beta, padding=PAD, dilation=DIL)
    out = jax.block_until_ready(out)

    ref = reference(x, w, b, gamma, beta, padding=PAD, dilation=DIL)
    assert out.shape == ref.shape, (out.shape, ref.shape)
    # Tolerance loosened vs. the pure-f32 version: MXU inputs are bf16 (f32 accumulate),
    # which introduces ~1e-3 relative error pre-normalization.
    assert jnp.allclose(out, ref, atol=5e-2, rtol=5e-2), float(jnp.max(jnp.abs(out - ref)))

    print("KERNEL_OK")
</pallas_src>

<mosaic_0001>
module attributes {stable_mosaic.version = 11 : i64} {
  func.func @_fused_conv_bn_relu_kernel(%arg0: i32, %arg1: memref<40x512xbf16, #tpu.memory_space<vmem>>, %arg2: memref<8x40xbf16, #tpu.memory_space<vmem>>, %arg3: memref<8x1xf32, #tpu.memory_space<vmem>>, %arg4: memref<8x1xf32, #tpu.memory_space<vmem>>, %arg5: memref<8x512xf32, #tpu.memory_space<vmem>>) attributes {dimension_semantics = [#tpu.dimension_semantics<arbitrary>], iteration_bounds = array<i64: 1>, scalar_prefetch = 0 : i64, scratch_operands = 0 : i64, tpu.core_type = #tpu.core_type<tc>, window_params = [{pipeline_mode = #tpu.pipeline_mode<synchronous>, transform_indices = @transform_0, window_bounds = array<i64: 40, 512>}, {pipeline_mode = #tpu.pipeline_mode<synchronous>, transform_indices = @transform_1, window_bounds = array<i64: 8, 40>}, {pipeline_mode = #tpu.pipeline_mode<synchronous>, transform_indices = @transform_2, window_bounds = array<i64: 8, 1>}, {pipeline_mode = #tpu.pipeline_mode<synchronous>, transform_indices = @transform_3, window_bounds = array<i64: 8, 1>}, {pipeline_mode = #tpu.pipeline_mode<synchronous>, transform_indices = @transform_4, window_bounds = array<i64: 8, 512>}]} {
    %c0 = arith.constant 0 : index
    %c0_0 = arith.constant 0 : index
    %0 = vector.load %arg2[%c0, %c0_0] : memref<8x40xbf16, #tpu.memory_space<vmem>>, vector<8x40xbf16>
    %c0_1 = arith.constant 0 : index
    %c0_2 = arith.constant 0 : index
    %1 = vector.load %arg1[%c0_1, %c0_2] : memref<40x512xbf16, #tpu.memory_space<vmem>>, vector<40x512xbf16>
    %cst = arith.constant dense<0.000000e+00> : vector<8x512xf32>
    %2 = tpu.matmul %0, %1, %cst {dimension_numbers = #tpu.dot_dimension_numbers<[1], [0], [0], [1], [0, 0, 1, 1], [], []>} : vector<8x40xbf16>, vector<40x512xbf16>, vector<8x512xf32> -> vector<8x512xf32>
    %cst_3 = arith.constant dense<0.000000e+00> : vector<8xf32>
    %3 = vector.multi_reduction <add>, %2, %cst_3 [1] : vector<8x512xf32> to vector<8xf32>
    %4 = vector.shape_cast %3 : vector<8xf32> to vector<8x1xf32>
    %cst_4 = arith.constant 5.120000e+02 : f32
    %5 = vector.broadcast %cst_4 : f32 to vector<8x1xf32>
    %6 = arith.divf %4, %5 : vector<8x1xf32>
    %7 = arith.mulf %2, %2 : vector<8x512xf32>
    %cst_5 = arith.constant dense<0.000000e+00> : vector<8xf32>
    %8 = vector.multi_reduction <add>, %7, %cst_5 [1] : vector<8x512xf32> to vector<8xf32>
    %9 = vector.shape_cast %8 : vector<8xf32> to vector<8x1xf32>
    %cst_6 = arith.constant 5.120000e+02 : f32
    %10 = vector.broadcast %cst_6 : f32 to vector<8x1xf32>
    %11 = arith.divf %9, %10 : vector<8x1xf32>
    %12 = arith.mulf %6, %6 : vector<8x1xf32>
    %13 = arith.subf %11, %12 : vector<8x1xf32>
    %cst_7 = arith.constant 9.99999974E-6 : f32
    %14 = vector.broadcast %cst_7 : f32 to vector<8x1xf32>
    %15 = arith.addf %13, %14 : vector<8x1xf32>
    %16 = math.rsqrt %15 : vector<8x1xf32>
    %c0_8 = arith.constant 0 : index
    %c0_9 = arith.constant 0 : index
    %17 = vector.load %arg3[%c0_8, %c0_9] : memref<8x1xf32, #tpu.memory_space<vmem>>, vector<8x1xf32>
    %18 = arith.mulf %17, %16 : vector<8x1xf32>
    %c0_10 = arith.constant 0 : index
    %c0_11 = arith.constant 0 : index
    %19 = vector.load %arg4[%c0_10, %c0_11] : memref<8x1xf32, #tpu.memory_space<vmem>>, vector<8x1xf32>
    %20 = arith.mulf %6, %18 : vector<8x1xf32>
    %21 = arith.subf %19, %20 : vector<8x1xf32>
    %22 = vector.broadcast %18 : vector<8x1xf32> to vector<8x512xf32>
    %23 = arith.mulf %2, %22 : vector<8x512xf32>
    %24 = vector.broadcast %21 : vector<8x1xf32> to vector<8x512xf32>
    %25 = arith.addf %23, %24 : vector<8x512xf32>
    %cst_12 = arith.constant 0.000000e+00 : f32
    %26 = vector.broadcast %cst_12 : f32 to vector<8x512xf32>
    %27 = arith.maximumf %25, %26 : vector<8x512xf32>
    %c0_13 = arith.constant 0 : index
    %c0_14 = arith.constant 0 : index
    %28 = vector.load %arg5[%c0_13, %c0_14] : memref<8x512xf32, #tpu.memory_space<vmem>>, vector<8x512xf32>
    tpu.vector_store %arg5[%c0_13, %c0_14], %27 {strides = array<i32>} : memref<8x512xf32, #tpu.memory_space<vmem>>, vector<8x512xf32>,
    return
  }
  func.func @transform_0(%arg0: i32) -> (i32, i32) {
    %c0_i32 = arith.constant 0 : i32
    %c0_i32_0 = arith.constant 0 : i32
    %c0_i32_1 = arith.constant 0 : i32
    return %c0_i32, %c0_i32_0 : i32, i32
  }
  func.func @transform_1(%arg0: i32) -> (i32, i32) {
    %c0_i32 = arith.constant 0 : i32
    %c0_i32_0 = arith.constant 0 : i32
    %c0_i32_1 = arith.constant 0 : i32
    return %c0_i32, %c0_i32_0 : i32, i32
  }
  func.func @transform_2(%arg0: i32) -> (i32, i32) {
    %c0_i32 = arith.constant 0 : i32
    %c0_i32_0 = arith.constant 0 : i32
    %c0_i32_1 = arith.constant 0 : i32
    return %c0_i32, %c0_i32_0 : i32, i32
  }
  func.func @transform_3(%arg0: i32) -> (i32, i32) {
    %c0_i32 = arith.constant 0 : i32
    %c0_i32_0 = arith.constant 0 : i32
    %c0_i32_1 = arith.constant 0 : i32
    return %c0_i32, %c0_i32_0 : i32, i32
  }
  func.func @transform_4(%arg0: i32) -> (i32, i32) {
    %c0_i32 = arith.constant 0 : i32
    %c0_i32_0 = arith.constant 0 : i32
    %c0_i32_1 = arith.constant 0 : i32
    return %c0_i32, %c0_i32_0 : i32, i32
  }
}

</mosaic_0001>

<bundles_post_ra>
// kernel: tpu_custom_call.1
= control target key start
LH: loop header
LB: loop body
LE: loop exit
PB: predicated region body
PF: predicated region fallthrough
CT: control target
= control target key end

     0   :  { %9 = vsyncpa [#allocation3], 0  ;;  %s412_s0 = inlined_call_operand.hbm [shape: bf16[40,512], index: 0, kind: input, shape index: {}]   ;;  %s413_s1 = inlined_call_operand.vmem [shape: bf16[8,40], index: 1, kind: input, shape index: {}]   ;;  %s414_s2 = inlined_call_operand.vmem [shape: f32[8,1], index: 2, kind: input, shape index: {}]   ;;  %s415_s3 = inlined_call_operand.vmem [shape: f32[8,1], index: 3, kind: input, shape index: {}]   ;;  %s416_s4 = inlined_call_operand.hbm [shape: f32[8,512], index: 4, kind: output, shape index: {}]  }
   0x1   :  { %10 = vsyncpa [#allocation4], 0  ;;  %s349_s15 = smov [#allocation2]   ;;  %s301_s19 = scalar_lea.hbm %s412_s0, 1280 }
   0x2   :  { %s16_s16 = sshll.u32 %s349_s15, 4  ;;  %p302_p0 = scmp.ne.s32.totalorder %s412_s0, %s301_s19  ;;  %s17_s16 = int_to_ptr.vmem [resolvable:$true] %s16_s16 }
   0x3   :  { %p305_p1 = scmp.lt.u32.totalorder %s301_s19, %s412_s0 }
   0x5   :  { %p307_p2 = pnand %p305_p1, %p302_p0 }
   0x7   :  { %310 = shalt.err (!%p307_p2)
}
   0x8   :  { %s311_s24 = scalar_lea.vmem %s17_s16, 1280  ;;  %p316_p4 = scmp.lt.s32.totalorder %s17_s16, %s17_s16 }
   0x9   :  { %p312_p3 = scmp.ne.s32.totalorder %s17_s16, %s311_s24  ;;  %p317_p5 = scmp.lt.s32.totalorder %s311_s24, %s311_s24 }
   0xb   :  { %p318_p6 = por %p317_p5, %p316_p4 }
   0xd   :  { %p319_p7 = pnand %p318_p6, %p312_p3 }
   0xf   :  { %322 = shalt.err (!%p319_p7)
}
  0x10   :  { %s350_s25 = smov 256   ;;  %s351_s26 = smov 16  }
  0x11   :  { %22 = dma.hbm_to_vmem [thread:$0]  %s412_s0, 1280, %s17_s16, [#allocation3], %s350_s25, %s350_s25, %s351_s26  }
  0x12   :  { %345 = dma.done.wait [#allocation3], 1280  }
  0x13   :  { %346 = vsyncadd [#allocation3], 4294966016  ;;  %v352_v0 = vmov 0   ;;  %v283_v1 = vld [vmem:[#allocation2 + $0x4] ss:$16 sps:$4 sm:$0xff]   ;;  %vm98_vm0 = vcmask 1043456  }
  0x14   :  { %143 = vmatprep.mubr.bf16.mxu0 %v352_v0  ;;  %184 = vmatprep.mubr.bf16.mxu1 %v352_v0  ;;  %v285_v2 = vld [vmem:[#allocation2 + $0xc] ss:$16 sps:$4 sm:$0xff]   ;;  %v287_v3 = vld [vmem:[#allocation2] ss:$16 sps:$4 sm:$0xff]   ;;  %v288_v4 = vld [vmem:[#allocation2 + $0x8] ss:$16 sps:$4 sm:$0xff]  }
  0x15   :  { %281 = vset.pattern.permute.xlu1 %v352_v0  ;;  %282 = vset.pattern.permute.xlu0 %v352_v0  ;;  %v289_v5 = vld [vmem:[#allocation2 + $0x24] ss:$16 sps:$4 sm:$0xff]   ;;  %v291_v6 = vld [vmem:[#allocation2 + $0x2c] ss:$16 sps:$4 sm:$0xff]   ;;  %v293_v7 = vld [vmem:[#allocation2 + $0x20] ss:$16 sps:$4 sm:$0xff]  }
  0x16   :  { %111 = vmatprep.subr.bf16.mxu0 %v283_v1  ;;  %152 = vmatprep.subr.bf16.mxu1 %v285_v2  ;;  %v294_v8 = vld [vmem:[#allocation2 + $0x28] ss:$16 sps:$4 sm:$0xff]   ;;  %v42_v9 = vld [vmem:[#allocation2 + $0x40] sm:$0xff]  ;;  %vm94_vm1 = vcmask 326656   ;;  %s353_s7 = smov [#allocation5]  }
  0x17   :  { %112 = vmatpush1.bf16.msra.mxu0 %v287_v3  ;;  %153 = vmatpush1.bf16.msra.mxu1 %v288_v4  ;;  %v43_v10 = vld [vmem:[#allocation2 + $0x48] sm:$0xff]  ;;  %v269_v11 = vcombine.high %v42_v9, %v42_v9  ;;  %v268_v13 = vcombine.low %v42_v9, %v42_v9  ;;  %v33_v17 = vld [vmem:[%s413_s1] sm:$0xf]  ;;  %s251_s8 = sshll.u32 %s353_s7, 4  ;;  %s252_s8 = int_to_ptr.vmem [resolvable:$true] %s251_s8 }
  0x18   :  { %113 = vmatprep.subr.bf16.mxu0 %v289_v5  ;;  %154 = vmatprep.subr.bf16.mxu1 %v291_v6  ;;  %v271_v12 = vcombine.high %v43_v10, %v43_v10  ;;  %v270_v14 = vcombine.low %v43_v10, %v43_v10  ;;  %v214_v43 = vld [vmem:[%s414_s2] sm:$0xff]  ;;  %s323_s2 = scalar_lea.vmem %s252_s8, 512  ;;  %p328_p9 = scmp.lt.s32.totalorder %s252_s8, %s252_s8 }
  0x19   :  { %v100_v15 = vsel %vm98_vm0, %v268_v13, 0  ;;  %v216_v46 = vld [vmem:[%s415_s3] sm:$0xff]  ;;  %p324_p8 = scmp.ne.s32.totalorder %s252_s8, %s323_s2  ;;  %p329_p10 = scmp.lt.s32.totalorder %s323_s2, %s323_s2 }
  0x1a   :  { %v106_v16 = vsel %vm98_vm0, %v270_v14, 0 }
  0x1b   :  { %114 = vmatpush1.bf16.msra.mxu0 %v293_v7  ;;  %155 = vmatpush1.bf16.msra.mxu1 %v294_v8  ;;  %p330_p11 = por %p329_p10, %p328_p9 }
  0x1c   :  { %272 = vmatprep.subr.msk.bf16.mxu0 %vm98_vm0, %v269_v11  ;;  %274 = vmatprep.subr.msk.bf16.mxu1 %vm98_vm0, %v271_v12 }
  0x1d   :  { %p331_p12 = pnand %p330_p11, %p324_p8 }
  0x1f   :  { %116 = vmatpush1.bf16.msra.mxu0 %v100_v15  ;;  %157 = vmatpush1.bf16.msra.mxu1 %v106_v16 }
  0x22   :  { %273 = vmatmul.mubr.msk.bf16.vlgmr.msra.gmra.mrb[0].mxu0 %vm94_vm1, %v33_v17  ;;  %275 = vmatmul.mubr.msk.bf16.vlgmr.msra.gmra.mrb[0].mxu1 %vm94_vm1, %v33_v17 }
  0xf5   :  { %v145_v18 = vpop.f32.mrb[0].mxu0  ;;  %v186_v19 = vpop.f32.mrb[0].mxu1 }
  0xf6   :  { %v200_v20 = vmul.f32 %v145_v18, %v145_v18  ;;  %v147_v21 = vpop.f32.mrb[1].mxu0  ;;  %v188_v22 = vpop.f32.mrb[1].mxu1  ;;  %v202_v23 = vmul.f32 %v186_v19, %v186_v19 }
  0xf7   :  { %v193_v24 = vadd.f32 %v147_v21, %v145_v18  ;;  %v201_v25 = vmul.f32 %v147_v21, %v147_v21  ;;  %v149_v26 = vpop.f32.mrb[2].mxu0  ;;  %v190_v27 = vpop.f32.mrb[2].mxu1  ;;  %v203_v33 = vmul.f32 %v188_v22, %v188_v22 }
  0xf8   :  { %v150_v28 = vpop.f32.mrb[3].mxu0  ;;  %v191_v29 = vpop.f32.mrb[3].mxu1 }
  0xf9   :  { %v194_v30 = vadd.f32 %v193_v24, %v186_v19  ;;  %v204_v31 = vadd.f32 %v201_v25, %v200_v20 }
  0xfb   :  { %v195_v32 = vadd.f32 %v194_v30, %v188_v22  ;;  %v205_v34 = vadd.f32 %v204_v31, %v202_v23 }
  0xfd   :  { %196 = vadd.xlane.f32.xlu0 %v195_v32  ;;  %v206_v35 = vadd.f32 %v205_v34, %v203_v33 }
 0x101   :  { %207 = vadd.xlane.f32.xlu0 %v206_v35 }
 0x18a   :  { %v197_v36 = vpop.xlane.xlu0 %196 }
 0x18b   :  { %v199_v37 = vmul.f32 0.001953125, %v197_v36 }
 0x18d   :  { %v210_v39 = vmul.f32 %v199_v37, %v199_v37 }
 0x18e   :  { %v208_v38 = vpop.xlane.xlu0 %207 }
 0x18f   :  { %v209_v40 = vmul.f32 0.001953125, %v208_v38 }
 0x191   :  { %v211_v41 = vsub.f32 %v209_v40, %v210_v39 }
 0x193   :  { %v212_v42 = vadd.f32 1e-05, %v211_v41 }
 0x195   :  { %299 = vrsqrt.f32 %v212_v42 }
 0x19f   :  { %v300_v44 = vpop.eup %299 }
 0x1a0   :  { %v215_v45 = vmul.f32 %v300_v44, %v214_v43 }
 0x1a2   :  { %221 = vperm.xlu1 %281, %v215_v45   ;;  %v217_v47 = vmul.f32 %v215_v45, %v199_v37 }
 0x1a4   :  { %v218_v48 = vsub.f32 %v216_v46, %v217_v47 }
 0x1a6   :  { %230 = vperm.xlu1 %281, %v218_v48  }
 0x221   :  { %v222_v49 = vpop.permute.xlu1 %221 }
 0x222   :  { %v224_v50 = vmul.f32 %v222_v49, %v145_v18  ;;  %v225_v51 = vmul.f32 %v222_v49, %v147_v21  ;;  %v226_v52 = vmul.f32 %v222_v49, %v186_v19  ;;  %v227_v53 = vmul.f32 %v222_v49, %v188_v22 }
 0x225   :  { %v231_v54 = vpop.permute.xlu1 %230 }
 0x226   :  { %v233_v55 = vadd.f32 %v231_v54, %v224_v50  ;;  %v234_v56 = vadd.f32 %v231_v54, %v225_v51  ;;  %v235_v57 = vadd.f32 %v231_v54, %v226_v52  ;;  %v236_v58 = vadd.f32 %v231_v54, %v227_v53 }
 0x228   :  { %v237_v59 = vmax.f32 %v233_v55, 0.0  ;;  %v238_v60 = vmax.f32 %v234_v56, 0.0  ;;  %v239_v61 = vmax.f32 %v235_v57, 0.0  ;;  %v240_v62 = vmax.f32 %v236_v58, 0.0 }
 0x22a   :  { %241 = vst [vmem:[#allocation5] sm:$0xff] %v237_v59  ;;  %242 = vst [vmem:[#allocation5 + $0x8] sm:$0xff] %v238_v60 }
 0x22b   :  { %243 = vst [vmem:[#allocation5 + $0x10] sm:$0xff] %v239_v61  ;;  %244 = vst [vmem:[#allocation5 + $0x18] sm:$0xff] %v240_v62 }
 0x22c   :  { %334 = shalt.err (!%p331_p12)
}
 0x22d   :  { %s335_s10 = scalar_lea.hbm %s416_s4, 512 }
 0x22e   :  { %p336_p13 = scmp.ne.s32.totalorder %s416_s4, %s335_s10  ;;  %p339_p0 = scmp.lt.u32.totalorder %s335_s10, %s416_s4 }
 0x230   :  { %p341_p1 = pnand %p339_p0, %p336_p13 }
 0x232   :  { %344 = shalt.err (!%p341_p1)
}
 0x233   :  { %254 = dma.vmem_to_hbm [thread:$0]  %s252_s8, 512, %s416_s4, [#allocation4]  }
 0x234   :  { %347 = dma.done.wait [#allocation4], 512  }
 0x235   :  { %348 = vsyncadd [#allocation4], 4294966784 }
 0x236   :  { %258 = vsyncpa [#allocation3], 1 }
 0x237   :  { %259 = vsyncpa [#allocation4], 1 }

</bundles_post_ra>
